<compile_context>
chip_gen: v7x
topology: tpu7x:2x2x1
jax: 0.10.0
libtpu: 0.0.40
codegen_flags: <defaults>
</compile_context>

<pallas_src>
import functools
import math

import jax
import jax.numpy as jnp
from jax.experimental import pallas as pl
from jax.experimental.pallas import tpu as pltpu

_MXU = jnp.bfloat16      # MXU input dtype (accumulation is always f32)
_LN_EPS = 1e-12          # espnet LayerNorm eps


@functools.lru_cache(maxsize=None)
def _big_vmem_limit():
    """~3/4 of physical VMEM (v5e/v6e: ~96 MiB, v7x: ~48 MiB), capped at 96 MiB."""
    try:
        phys = int(pltpu.get_tpu_info().vmem_capacity_bytes)
    except Exception:
        phys = 128 * 1024 * 1024
    return int(min(96 * 1024 * 1024, (phys * 3) // 4))


# ----------------------------- Pallas kernels -----------------------------

def _linear_kernel(x_ref, w_ref, b_ref, o_ref, *, activation):
    y = jnp.dot(x_ref[...].astype(_MXU), w_ref[...],
                preferred_element_type=jnp.float32) + b_ref[...]
    if activation == "relu":
        y = jnp.maximum(y, 0.0)
    o_ref[...] = y.astype(o_ref.dtype)


def linear(x2d, w, b, activation=None, out_dtype=jnp.float32, tile_m=512):
    """y = act(x @ w + b); rows tiled with a parallel grid, weight kept resident.

    Activations may be bf16 (they are cast to the MXU dtype in-kernel anyway)."""
    M, K = x2d.shape
    N = w.shape[1]
    tm = M if M <= tile_m else tile_m          # tile_m is a multiple of 8
    kernel = functools.partial(_linear_kernel, activation=activation)
    return pl.pallas_call(
        kernel,
        out_shape=jax.ShapeDtypeStruct((M, N), out_dtype),
        grid=(pl.cdiv(M, tm),),
        in_specs=[pl.BlockSpec((tm, K), lambda i: (i, 0)),
                  pl.BlockSpec((K, N), lambda i: (0, 0)),
                  pl.BlockSpec((1, N), lambda i: (0, 0))],
        out_specs=pl.BlockSpec((tm, N), lambda i: (i, 0)),
        compiler_params=pltpu.CompilerParams(dimension_semantics=("parallel",)),
    )(x2d, w.astype(_MXU), b.reshape(1, N).astype(jnp.float32))


def _embed_pe_kernel(x_ref, w_ref, b_ref, pe_ref, o_ref):
    # embed linear (+ folded sqrt(d_model) scale) + positional encoding, fused.
    y = jnp.dot(x_ref[0].astype(_MXU), w_ref[...],
                preferred_element_type=jnp.float32)
    o_ref[0] = (y + b_ref[...] + pe_ref[...]).astype(o_ref.dtype)


def embed_pe(x3d, w, b, pe):
    B, T, K = x3d.shape
    D = w.shape[1]
    return pl.pallas_call(
        _embed_pe_kernel,
        out_shape=jax.ShapeDtypeStruct((B, T, D), jnp.float32),
        grid=(B,),
        in_specs=[pl.BlockSpec((1, T, K), lambda b: (b, 0, 0)),
                  pl.BlockSpec((K, D), lambda b: (0, 0)),
                  pl.BlockSpec((1, D), lambda b: (0, 0)),
                  pl.BlockSpec((T, D), lambda b: (0, 0))],   # PE shared across batch
        out_specs=pl.BlockSpec((1, T, D), lambda b: (b, 0, 0)),
        compiler_params=pltpu.CompilerParams(
            dimension_semantics=("parallel",),
            vmem_limit_bytes=_big_vmem_limit()),
    )(x3d, w.astype(_MXU), b.reshape(1, D).astype(jnp.float32), pe)


def _encoder_layer_kernel(h_ref, m_ref,
                          ln1g_ref, ln1b_ref, wqkv_ref, bqkv_ref, wo_ref, bo_ref,
                          ln2g_ref, ln2b_ref, w1_ref, b1_ref, w2_ref, b2_ref,
                          o_ref, ctx_ref, *, aheads):
    """One full pre-norm transformer encoder layer for one batch element, fused."""
    h = h_ref[0]                       # (T, D) f32
    valid = m_ref[0] > 0.5             # (1, T) key validity
    T, D = h.shape
    dk = D // aheads
    neg = jnp.finfo(jnp.float32).min

    def layer_norm(x, g, b):
        mean = jnp.mean(x, axis=-1, keepdims=True)
        var = jnp.mean((x - mean) ** 2, axis=-1, keepdims=True)
        return (x - mean) * jax.lax.rsqrt(var + _LN_EPS) * g + b

    # ---- multi-head self-attention (pre-norm, residual) ----
    xn = layer_norm(h, ln1g_ref[...], ln1b_ref[...])
    qkv = jnp.dot(xn.astype(_MXU), wqkv_ref[...],
                  preferred_element_type=jnp.float32) + bqkv_ref[...]   # (T, 3D)

    # Per-head scores / softmax / context; each head's context is stored into its column
    # slice of a (T, D) VMEM scratch so the output projection below is a single K=D GEMM.
    # TODO(synk): head-major/128-aligned QKV layout would remove the remaining per-head
    #             lane-misaligned slice relayouts.
    for hh in range(aheads):
        q = qkv[:, hh * dk:(hh + 1) * dk]                 # Q pre-scaled by 1/sqrt(dk)
        k = qkv[:, D + hh * dk:D + (hh + 1) * dk]
        v = qkv[:, 2 * D + hh * dk:2 * D + (hh + 1) * dk]
        # q @ k.T without an explicit transpose op (contract last dims).
        s = jax.lax.dot_general(q.astype(_MXU), k.astype(_MXU),
                                (((1,), (1,)), ((), ())),
                                preferred_element_type=jnp.float32)     # (T, T)
        s = jnp.where(valid, s, neg)
        s = s - jnp.max(s, axis=-1, keepdims=True)
        e = jnp.exp(s)
        p = e * pl.reciprocal(jnp.sum(e, axis=-1, keepdims=True), approx=True)
        p = jnp.where(valid, p, 0.0)                      # masked_fill(mask==0, 0.0)
        ctx_ref[:, hh * dk:(hh + 1) * dk] = jnp.dot(
            p.astype(_MXU), v.astype(_MXU), preferred_element_type=jnp.float32)

    # single full-width output projection (K = D) + residual.
    attn_out = jnp.dot(ctx_ref[...].astype(_MXU), wo_ref[...],
                       preferred_element_type=jnp.float32) + bo_ref[...]
    h = h + attn_out

    # ---- position-wise feed-forward (pre-norm, residual) ----
    xn = layer_norm(h, ln2g_ref[...], ln2b_ref[...])
    ff = jnp.maximum(jnp.dot(xn.astype(_MXU), w1_ref[...],
                             preferred_element_type=jnp.float32) + b1_ref[...], 0.0)
    h = h + jnp.dot(ff.astype(_MXU), w2_ref[...],
                    preferred_element_type=jnp.float32) + b2_ref[...]
    o_ref[0] = h.astype(o_ref.dtype)


def encoder_layer(h, mask_f, ln1_g, ln1_b, wqkv, bqkv, wo, bo, ln2_g, ln2_b,
                  w1, b1, w2, b2, *, aheads):
    B, T, D = h.shape
    E = w1.shape[1]
    kernel = functools.partial(_encoder_layer_kernel, aheads=aheads)

    def rep(shape):   # replicated (weight) operand: same block for every grid step
        return pl.BlockSpec(shape, lambda b: (0,) * len(shape))

    # TODO(synk): for v7x (2 TensorCores) add a second parallel grid axis (query-tile over T)
    #             so small-B batches still occupy both cores.
    return pl.pallas_call(
        kernel,
        out_shape=jax.ShapeDtypeStruct((B, T, D), jnp.float32),
        grid=(B,),
        in_specs=[pl.BlockSpec((1, T, D), lambda b: (b, 0, 0)),
                  pl.BlockSpec((1, 1, T), lambda b: (b, 0, 0)),
                  rep((1, D)), rep((1, D)),
                  rep((D, 3 * D)), rep((1, 3 * D)),
                  rep((D, D)), rep((1, D)),
                  rep((1, D)), rep((1, D)),
                  rep((D, E)), rep((1, E)),
                  rep((E, D)), rep((1, D))],
        out_specs=pl.BlockSpec((1, T, D), lambda b: (b, 0, 0)),
        scratch_shapes=[pltpu.VMEM((T, D), jnp.float32)],   # concatenated per-head context
        compiler_params=pltpu.CompilerParams(
            dimension_semantics=("parallel",),
            vmem_limit_bytes=_big_vmem_limit()),
    )(h, mask_f,
      ln1_g.reshape(1, D), ln1_b.reshape(1, D),
      wqkv.astype(_MXU), bqkv.reshape(1, 3 * D).astype(jnp.float32),
      wo.astype(_MXU), bo.reshape(1, D),
      ln2_g.reshape(1, D), ln2_b.reshape(1, D),
      w1.astype(_MXU), b1.reshape(1, E),
      w2.astype(_MXU), b2.reshape(1, D))


def _norm_linear_kernel(x_ref, g_ref, b_ref, w_ref, wb_ref, o_ref):
    # encoder after_norm fused with the poster projection.
    x = x_ref[...].astype(jnp.float32)
    mean = jnp.mean(x, axis=-1, keepdims=True)
    var = jnp.mean((x - mean) ** 2, axis=-1, keepdims=True)
    xn = (x - mean) * jax.lax.rsqrt(var + _LN_EPS) * g_ref[...] + b_ref[...]
    y = jnp.dot(xn.astype(_MXU), w_ref[...],
                preferred_element_type=jnp.float32) + wb_ref[...]
    o_ref[...] = y.astype(o_ref.dtype)


def norm_linear(x2d, g, b, w, wb, tile_m=512):
    """after_norm + poster GEMM.  The output column count is padded up to a multiple of
    128 inside the kernel (lane-dense vst instead of masked partial stores); the zero
    columns are sliced off outside."""
    M, D = x2d.shape
    N = w.shape[1]
    n_pad = (-N) % 128
    if n_pad:
        w = jnp.pad(w, ((0, 0), (0, n_pad)))
        wb = jnp.pad(wb, (0, n_pad))
    Np = N + n_pad
    tm = M if M <= tile_m else tile_m
    out = pl.pallas_call(
        _norm_linear_kernel,
        out_shape=jax.ShapeDtypeStruct((M, Np), jnp.float32),
        grid=(pl.cdiv(M, tm),),
        in_specs=[pl.BlockSpec((tm, D), lambda i: (i, 0)),
                  pl.BlockSpec((1, D), lambda i: (0, 0)),
                  pl.BlockSpec((1, D), lambda i: (0, 0)),
                  pl.BlockSpec((D, Np), lambda i: (0, 0)),
                  pl.BlockSpec((1, Np), lambda i: (0, 0))],
        out_specs=pl.BlockSpec((tm, Np), lambda i: (i, 0)),
        compiler_params=pltpu.CompilerParams(dimension_semantics=("parallel",)),
    )(x2d, g.reshape(1, D), b.reshape(1, D), w.astype(_MXU), wb.reshape(1, Np))
    return out[:, :N] if n_pad else out


def _loss_acc_kernel(logit_ref, tgt_ref, loss_ref, corr_ref, keep_ref, *,
                     n_rows, conf, low, const_ent, ignore_id):
    i = pl.program_id(0)

    @pl.when(i == 0)
    def _():
        loss_ref[0, 0] = 0.0
        corr_ref[0, 0] = 0.0
        keep_ref[0, 0] = 0.0

    x = logit_ref[...].astype(jnp.float32)      # (tm, V)
    tgt = tgt_ref[...]                          # (tm, 1) int32
    tm, V = x.shape
    row = jax.lax.broadcasted_iota(jnp.int32, (tm, 1), 0) + i * tm
    ignore = jnp.logical_or(tgt == ignore_id, row >= n_rows)   # also masks M-padding rows
    keep = jnp.logical_not(ignore)

    # analytic label-smoothing KL: no true_dist / log(true_dist) materialization.
    mx = jnp.max(x, axis=-1, keepdims=True)
    lse = jnp.log(jnp.sum(jnp.exp(x - mx), axis=-1, keepdims=True)) + mx
    col = jax.lax.broadcasted_iota(jnp.int32, (tm, V), 1)
    tgt_c = jnp.where(ignore, 0, tgt)
    x_t = jnp.sum(jnp.where(col == tgt_c, x, 0.0), axis=-1, keepdims=True)
    logp_t = x_t - lse
    sum_logp = jnp.sum(x, axis=-1, keepdims=True) - V * lse
    row_loss = const_ent - conf * logp_t - low * (sum_logp - logp_t)

    # th_accuracy: argmax (lowest index on ties) vs target on kept rows.
    amax = jnp.min(jnp.where(x == mx, col, V), axis=-1, keepdims=True)
    correct = jnp.logical_and(amax == tgt, keep)

    loss_ref[0, 0] += jnp.sum(jnp.where(keep, row_loss, 0.0))
    corr_ref[0, 0] += jnp.sum(correct.astype(jnp.float32))
    keep_ref[0, 0] += jnp.sum(keep.astype(jnp.float32))


def label_smoothing_loss_and_acc(pred, ys, smoothing, ignore_id,
                                 tile_bytes=6 << 20):
    B, L, V = pred.shape
    M = B * L
    logits = pred.reshape(M, V)
    tgt = ys.reshape(M, 1).astype(jnp.int32)

    conf = 1.0 - smoothing
    low = smoothing / (V - 1) if V > 1 else 0.0
    const_ent = conf * math.log(conf) if conf > 0.0 else 0.0
    if low > 0.0:
        const_ent += (V - 1) * low * math.log(low)

    if M * V * 4 <= tile_bytes:
        tm = M
    else:
        tm = min(M, max(8, (tile_bytes // (V * 4)) // 8 * 8))

    kernel = functools.partial(_loss_acc_kernel, n_rows=M, conf=conf, low=low,
                               const_ent=const_ent, ignore_id=ignore_id)
    smem = pl.BlockSpec(memory_space=pltpu.MemorySpace.SMEM)
    loss_s, corr_s, keep_s = pl.pallas_call(
        kernel,
        out_shape=(jax.ShapeDtypeStruct((1, 1), jnp.float32),
                   jax.ShapeDtypeStruct((1, 1), jnp.float32),
                   jax.ShapeDtypeStruct((1, 1), jnp.float32)),
        grid=(pl.cdiv(M, tm),),
        in_specs=[pl.BlockSpec((tm, V), lambda i: (i, 0)),
                  pl.BlockSpec((tm, 1), lambda i: (i, 0))],
        out_specs=(smem, smem, smem),
        compiler_params=pltpu.CompilerParams(dimension_semantics=("arbitrary",)),
    )(logits, tgt)
    total = jnp.maximum(keep_s[0, 0], 1.0)   # guard all-ignored (torch would produce NaN)
    return loss_s[0, 0] / total, corr_s[0, 0] / total


# ----------------------------- JAX glue -----------------------------

def im2col(x_nhwc, kh=3, kw=3, stride=2):
    """Extract 3x3 stride-2 patches; flatten order (C_in, kh, kw) to match torch conv weight."""
    B, H, W, C = x_nhwc.shape
    Ho = (H - kh) // stride + 1
    Wo = (W - kw) // stride + 1
    cols = []
    for i in range(kh):
        for j in range(kw):
            cols.append(x_nhwc[:, i:i + stride * (Ho - 1) + 1:stride,
                               j:j + stride * (Wo - 1) + 1:stride, :])
    p = jnp.stack(cols, axis=-1)               # (B, Ho, Wo, C, kh*kw)
    return p.reshape(B, Ho, Wo, C * kh * kw), Ho, Wo


def sinusoidal_pe(T, D):
    pos = jnp.arange(T, dtype=jnp.float32)[:, None]
    div = jnp.exp(jnp.arange(0, D, 2, dtype=jnp.float32) * -(math.log(10000.0) / D))
    pe = jnp.zeros((T, D), jnp.float32)
    pe = pe.at[:, 0::2].set(jnp.sin(pos * div))
    pe = pe.at[:, 1::2].set(jnp.cos(pos * div))
    return pe


def init_params(key, idim, odim, adim, aheads, eunits, elayers, oversampling):
    f2 = ((idim - 1) // 2 - 1) // 2
    ks = iter(jax.random.split(key, 16 + 12 * elayers))

    def dense(shape, scale=0.1):
        return scale * jax.random.normal(next(ks), shape, dtype=jnp.float32)

    p = {
        "conv1_w": dense((adim, 1, 3, 3)), "conv1_b": dense((adim,), 0.01),
        "conv2_w": dense((adim, adim, 3, 3)), "conv2_b": dense((adim,), 0.01),
        "embed_w": dense((adim * f2, adim)), "embed_b": dense((adim,), 0.01),
        "after_g": jnp.ones((adim,), jnp.float32),
        "after_b": jnp.zeros((adim,), jnp.float32),
        "poster_w": dense((adim, odim * oversampling)),
        "poster_b": dense((odim * oversampling,), 0.01),
        "layers": [],
    }
    for _ in range(elayers):
        lp = {
            "ln1_g": jnp.ones((adim,), jnp.float32), "ln1_b": jnp.zeros((adim,), jnp.float32),
            "ln2_g": jnp.ones((adim,), jnp.float32), "ln2_b": jnp.zeros((adim,), jnp.float32),
            "wq": dense((adim, adim)), "bq": dense((adim,), 0.01),
            "wk": dense((adim, adim)), "bk": dense((adim,), 0.01),
            "wv": dense((adim, adim)), "bv": dense((adim,), 0.01),
            "wo": dense((adim, adim)), "bo": dense((adim,), 0.01),
            "w1": dense((adim, eunits)), "b1": dense((eunits,), 0.01),
            "w2": dense((eunits, adim)), "b2": dense((adim,), 0.01),
        }
        p["layers"].append(lp)
    return p


def e2e_forward(params, xs_pad, ilens, ys_pad, *, odim, adim, aheads,
                oversampling, lsm_weight=0.1, ignore_id=-1):
    B, _, idim = xs_pad.shape
    # NOTE: concretizes max(ilens); like the torch code this re-specializes per length bucket.
    tmax = int(jnp.max(ilens))
    xs = xs_pad[:, :tmax]
    ys = ys_pad
    if xs.shape[1] != ys.shape[1]:
        if xs.shape[1] < ys.shape[1]:
            ys = ys[:, :xs.shape[1]]
        else:
            raise ValueError("target size smaller than input size")

    # src mask (B, 1, T)
    src_mask = (jnp.arange(tmax)[None, :] < ilens[:, None])[:, None, :]

    # ---- Encoder.embed: Conv2dSubsampling (im2col + tiled Pallas GEMM, ReLU fused) ----
    # Activations flow through the conv GEMMs in bf16 (same numerics: the MXU input cast
    # happens anyway), halving the HBM traffic of the 9x patch tensors.
    # TODO(synk): fully fuse the im2col gather into the conv GEMM kernel (shifted VMEM reads)
    #             to avoid materializing the 9x patch expansion in HBM at all.
    x = xs.astype(_MXU)[..., None]                        # (B, T, F, 1) NHWC bf16
    p1, T1, F1 = im2col(x)
    w1 = params["conv1_w"].reshape(adim, -1).T            # (1*3*3, adim)
    y1 = linear(p1.reshape(B * T1 * F1, -1), w1, params["conv1_b"],
                activation="relu", out_dtype=_MXU)
    y1 = y1.reshape(B, T1, F1, adim)
    p2, T2, F2 = im2col(y1)
    w2 = params["conv2_w"].reshape(adim, -1).T            # (adim*3*3, adim)
    y2 = linear(p2.reshape(B * T2 * F2, -1), w2, params["conv2_b"],
                activation="relu", out_dtype=_MXU)
    y2 = y2.reshape(B, T2, F2 * adim)                     # f-major flatten (no runtime transpose)

    # embed linear + x*sqrt(d_model) + PE fused into one kernel; torch's
    # (b,c,t,f)->(b,t,c*f) permutation and the sqrt(d_model) scale are folded into the weight.
    sqrt_d = math.sqrt(adim)
    embed_w = (params["embed_w"].reshape(adim, F2, adim).transpose(1, 0, 2)
               .reshape(F2 * adim, adim) * sqrt_d)
    embed_b = params["embed_b"] * sqrt_d
    pe = sinusoidal_pe(T2, adim)
    h = embed_pe(y2, embed_w, embed_b, pe)                # (B, T2, adim) f32

    # subsampled mask: x_mask[:, :, :-2:2][:, :, :-2:2]
    hs_mask = src_mask[:, :, :-2:2][:, :, :-2:2]          # (B, 1, T2)
    mask_f = hs_mask.astype(jnp.float32)

    # ---- Encoder layers: one fused Pallas kernel per layer (grid over batch) ----
    # TODO(synk): for small-B / many-layer configs, stacking layer weights and keeping h
    #             resident in VMEM across a trailing 'arbitrary' layer axis saves the
    #             per-layer activation round trips (not done here: it re-DMAs the full
    #             weight stack per batch element, which loses for realistic B).
    d_k = adim // aheads
    qscale = 1.0 / math.sqrt(d_k)                         # folded into the Q projection
    for lp in params["layers"]:
        wqkv = jnp.concatenate([lp["wq"] * qscale, lp["wk"], lp["wv"]], axis=1)
        bqkv = jnp.concatenate([lp["bq"] * qscale, lp["bk"], lp["bv"]])
        h = encoder_layer(h, mask_f,
                          lp["ln1_g"], lp["ln1_b"], wqkv, bqkv,
                          lp["wo"], lp["bo"], lp["ln2_g"], lp["ln2_b"],
                          lp["w1"], lp["b1"], lp["w2"], lp["b2"], aheads=aheads)

    # ---- after_norm fused with poster + oversampling reshape (outer=0 branch) ----
    post = norm_linear(h.reshape(B * T2, adim), params["after_g"], params["after_b"],
                       params["poster_w"], params["poster_b"])
    pred = post.reshape(B, T2 * oversampling, odim)

    if pred.shape[1] != ys.shape[1]:
        if pred.shape[1] < ys.shape[1]:
            ys = ys[:, :pred.shape[1]]
        else:
            raise ValueError("target / pred size mismatch")

    # ---- LabelSmoothingLoss + th_accuracy (mtlalpha=0 => loss = loss_att) ----
    # TODO(synk): CTC branch (mtlalpha > 0), error_calculator / reporter are inference-time /
    #             python-side bookkeeping and are not translated to Pallas.
    loss, acc = label_smoothing_loss_and_acc(pred, ys, lsm_weight, ignore_id)
    return loss, acc, pred


if __name__ == "__main__":
    B, Tmax, idim = 2, 16, 16
    odim, adim, aheads, eunits, elayers, oversampling = 10, 32, 4, 64, 2, 4

    key = jax.random.PRNGKey(0)
    kx, ky, kp = jax.random.split(key, 3)
    xs_pad = jax.random.normal(kx, (B, Tmax, idim), dtype=jnp.float32)
    ilens = jnp.array([16, 7], dtype=jnp.int32)
    ys_pad = jax.random.randint(ky, (B, Tmax), 0, odim, dtype=jnp.int32)
    ys_pad = ys_pad.at[1, 9:].set(-1)   # some ignore_id padding in targets

    params = init_params(kp, idim, odim, adim, aheads, eunits, elayers, oversampling)

    loss, acc, pred = e2e_forward(params, xs_pad, ilens, ys_pad,
                                  odim=odim, adim=adim, aheads=aheads,
                                  oversampling=oversampling)
    jax.block_until_ready((loss, acc, pred))
    print("loss_att =", float(loss), " acc =", float(acc), " pred_pad shape =", pred.shape)
    print("KERNEL_OK")
</pallas_src>

<mosaic_0001>
module attributes {stable_mosaic.version = 11 : i64} {
  func.func @_linear_kernel(%arg0: i32, %arg1: memref<98x9xbf16, #tpu.memory_space<vmem>>, %arg2: memref<9x32xbf16, #tpu.memory_space<vmem>>, %arg3: memref<1x32xf32, #tpu.memory_space<vmem>>, %arg4: memref<98x32xbf16, #tpu.memory_space<vmem>>) attributes {dimension_semantics = [#tpu.dimension_semantics<parallel>], iteration_bounds = array<i64: 1>, scalar_prefetch = 0 : i64, scratch_operands = 0 : i64, tpu.core_type = #tpu.core_type<tc>, window_params = [{transform_indices = @transform_0, window_bounds = array<i64: 98, 9>}, {pipeline_mode = #tpu.pipeline_mode<synchronous>, transform_indices = @transform_1, window_bounds = array<i64: 9, 32>}, {pipeline_mode = #tpu.pipeline_mode<synchronous>, transform_indices = @transform_2, window_bounds = array<i64: 1, 32>}, {transform_indices = @transform_3, window_bounds = array<i64: 98, 32>}]} {
    %c0 = arith.constant 0 : index
    %c0_0 = arith.constant 0 : index
    %0 = vector.load %arg1[%c0, %c0_0] : memref<98x9xbf16, #tpu.memory_space<vmem>>, vector<98x9xbf16>
    %c0_1 = arith.constant 0 : index
    %c0_2 = arith.constant 0 : index
    %1 = vector.load %arg2[%c0_1, %c0_2] : memref<9x32xbf16, #tpu.memory_space<vmem>>, vector<9x32xbf16>
    %cst = arith.constant dense<0.000000e+00> : vector<98x32xf32>
    %2 = tpu.matmul %0, %1, %cst {dimension_numbers = #tpu.dot_dimension_numbers<[1], [0], [0], [1], [0, 0, 1, 1], [], []>} : vector<98x9xbf16>, vector<9x32xbf16>, vector<98x32xf32> -> vector<98x32xf32>
    %c0_3 = arith.constant 0 : index
    %c0_4 = arith.constant 0 : index
    %3 = vector.load %arg3[%c0_3, %c0_4] : memref<1x32xf32, #tpu.memory_space<vmem>>, vector<1x32xf32>
    %4 = vector.broadcast %3 : vector<1x32xf32> to vector<98x32xf32>
    %5 = arith.addf %2, %4 : vector<98x32xf32>
    %cst_5 = arith.constant 0.000000e+00 : f32
    %6 = vector.broadcast %cst_5 : f32 to vector<98x32xf32>
    %7 = arith.maximumf %5, %6 : vector<98x32xf32>
    %8 = arith.truncf %7 : vector<98x32xf32> to vector<98x32xbf16>
    %c0_6 = arith.constant 0 : index
    %c0_7 = arith.constant 0 : index
    %9 = vector.load %arg4[%c0_6, %c0_7] : memref<98x32xbf16, #tpu.memory_space<vmem>>, vector<98x32xbf16>
    tpu.vector_store %arg4[%c0_6, %c0_7], %8 {strides = array<i32>} : memref<98x32xbf16, #tpu.memory_space<vmem>>, vector<98x32xbf16>,
    return
  }
  func.func @transform_0(%arg0: i32) -> (i32, i32) {
    %c0_i32 = arith.constant 0 : i32
    %c0_i32_0 = arith.constant 0 : i32
    return %arg0, %c0_i32 : i32, i32
  }
  func.func @transform_1(%arg0: i32) -> (i32, i32) {
    %c0_i32 = arith.constant 0 : i32
    %c0_i32_0 = arith.constant 0 : i32
    %c0_i32_1 = arith.constant 0 : i32
    return %c0_i32, %c0_i32_0 : i32, i32
  }
  func.func @transform_2(%arg0: i32) -> (i32, i32) {
    %c0_i32 = arith.constant 0 : i32
    %c0_i32_0 = arith.constant 0 : i32
    %c0_i32_1 = arith.constant 0 : i32
    return %c0_i32, %c0_i32_0 : i32, i32
  }
  func.func @transform_3(%arg0: i32) -> (i32, i32) {
    %c0_i32 = arith.constant 0 : i32
    %c0_i32_0 = arith.constant 0 : i32
    return %arg0, %c0_i32 : i32, i32
  }
}

</mosaic_0001>

<bundles_post_ra>
// kernel: tpu_custom_call.1
= control target key start
LH: loop header
LB: loop body
LE: loop exit
PB: predicated region body
PF: predicated region fallthrough
CT: control target
= control target key end

     0   :  { %vm97_vm0 = vcmask 1043456   ;;  %vm98_vm1 = vcmask 1044480   ;;  %v370_v0 = vmov 0.0   ;;  %v371_v2 = vmov 65535   ;;  %s500_s1 = inlined_call_operand.vmem [shape: bf16[9,32], index: 1, kind: input, shape index: {}]   ;;  %s501_s0 = inlined_call_operand.vmem [shape: bf16[98,9], index: 0, kind: input, shape index: {}]   ;;  %s502_s2 = inlined_call_operand.vmem [shape: f32[1,32], index: 2, kind: input, shape index: {}]   ;;  %s503_s3 = inlined_call_operand.vmem [shape: bf16[98,32], index: 3, kind: output, shape index: {}]  }
   0x1   :  { %327 = vmatprep.subr.bf16.mxu0 %v370_v0  ;;  %v362_v1 = vld [vmem:[%s500_s1] sm:$0x1f]   ;;  %357 = vmatprep.subr.bf16.mxu1 %v370_v0  ;;  %v99_v3 = vsel %vm97_vm0, 4294967295, %v371_v2  ;;  %vm372_vm2 = vmmov 0   ;;  %vm75_vm3 = vcmask 72704   ;;  %v365_v8 = vld [vmem:[%s501_s0 + $0x8] sm:$0xff]  }
   0x2   :  { %v100_v4 = vsel %vm98_vm1, %v99_v3, 0  ;;  %329 = vmatprep.mubr.msk.bf16.mxu0 %vm372_vm2, %v370_v0  ;;  %v363_v5 = vld [vmem:[%s501_s0] sm:$0xff]   ;;  %345 = vmatprep.mubr.msk.bf16.mxu1 %vm372_vm2, %v370_v0  ;;  %v366_v9 = vld [vmem:[%s501_s0 + $0x28] sm:$0xff]   ;;  %v367_v10 = vld [vmem:[%s501_s0 + $0x10] sm:$0xff]   ;;  %vm258_vm4 = vcmask 257024   ;;  %vm271_vm5 = vcmask 253952  }
   0x3   :  { %v102_v6 = vand.u32 %v362_v1, %v100_v4  ;;  %v364_v7 = vld [vmem:[%s501_s0 + $0x20] sm:$0xff]   ;;  %v368_v11 = vld [vmem:[%s501_s0 + $0x30] ss:$0 sps:$4 sm:$0x11]   ;;  %v369_v12 = vld [vmem:[%s501_s0 + $0x18] sm:$0xff]  }
   0x4   :  { %v434_v13 = vld [vmem:[%s502_s2] ss:$0 sm:$0xff] }
   0x5   :  { %328 = vmatpush3.bf16.msra.mxu0 %v102_v6  ;;  %358 = vmatpush3.bf16.msra.mxu1 %v102_v6 }
   0x8   :  { %330 = vmatmul.mubr.msk.bf16.vlgmr.msra.gmra.mrb[0].mxu0 %vm75_vm3, %v363_v5  ;;  %346 = vmatmul.mubr.msk.bf16.vlgmr.msra.gmra.mrb[0].mxu1 %vm75_vm3, %v364_v7 }
   0x9   :  { %333 = vmatprep.mubr.msk.bf16.mxu0 %vm372_vm2, %v370_v0  ;;  %349 = vmatprep.mubr.msk.bf16.mxu1 %vm372_vm2, %v370_v0 }
  0x10   :  { %334 = vmatmul.mubr.msk.bf16.gmra.mrb[4].mxu0 %vm75_vm3, %v365_v8  ;;  %350 = vmatmul.mubr.msk.bf16.gmra.mrb[4].mxu1 %vm75_vm3, %v366_v9 }
  0x11   :  { %337 = vmatprep.mubr.msk.bf16.mxu0 %vm372_vm2, %v370_v0  ;;  %353 = vmatprep.mubr.msk.bf16.mxu1 %vm372_vm2, %v370_v0 }
  0x18   :  { %338 = vmatmul.mubr.msk.bf16.gmra.mrb[8].mxu0 %vm75_vm3, %v367_v10  ;;  %354 = vmatmul.mubr.msk.bf16.gmra.mrb[8].mxu1 %vm75_vm3, %v368_v11 }
  0x19   :  { %341 = vmatprep.mubr.msk.bf16.mxu0 %vm372_vm2, %v370_v0 }
  0x20   :  { %342 = vmatmul.mubr.msk.bf16.gmra.mrb[12].mxu0 %vm75_vm3, %v369_v12 }
  0xdb   :  { %v138_v14 = vpop.f32.mrb[0].mxu0  ;;  %v170_v15 = vpop.f32.mrb[0].mxu1 }
  0xdc   :  { %v139_v16 = vadd.f32 %v434_v13, %v138_v14  ;;  %v331_v17 = vpop.f32.mrb[1].mxu0  ;;  %v171_v18 = vadd.f32 %v434_v13, %v170_v15  ;;  %v347_v19 = vpop.f32.mrb[1].mxu1 }
  0xdd   :  { %v141_v20 = vpop.f32.mrb[2].mxu0  ;;  %v173_v21 = vpop.f32.mrb[2].mxu1 }
  0xde   :  { %v192_v22 = vmax.f32 %v139_v16, 0.0  ;;  %v142_v23 = vadd.f32 %v434_v13, %v141_v20  ;;  %v332_v24 = vpop.f32.mrb[3].mxu0  ;;  %v200_v25 = vmax.f32 %v171_v18, 0.0  ;;  %v174_v26 = vadd.f32 %v434_v13, %v173_v21  ;;  %v348_v27 = vpop.f32.mrb[3].mxu1 }
  0xe0   :  { %v306_v28 = vpack.c.bf16 %v192_v22, %v192_v22  ;;  %v193_v29 = vmax.f32 %v142_v23, 0.0  ;;  %v314_v30 = vpack.c.bf16 %v200_v25, %v200_v25  ;;  %v201_v31 = vmax.f32 %v174_v26, 0.0 }
  0xe2   :  { %259 = vst.msk [vmem:[%s503_s3] sm:$0xf] %vm258_vm4, %v306_v28  ;;  %v307_v32 = vpack.c.bf16 %v193_v29, %v193_v29  ;;  %267 = vst.msk [vmem:[%s503_s3 + $0x20] sm:$0xf] %vm258_vm4, %v314_v30  ;;  %v315_v33 = vpack.c.bf16 %v201_v31, %v201_v31 }
  0xe3   :  { %v146_v34 = vpop.f32.mrb[4].mxu0  ;;  %v178_v35 = vpop.f32.mrb[4].mxu1 }
  0xe4   :  { %260 = vst.msk [vmem:[%s503_s3 + $0x4] sm:$0xf] %vm258_vm4, %v307_v32  ;;  %v147_v36 = vadd.f32 %v434_v13, %v146_v34  ;;  %v335_v37 = vpop.f32.mrb[5].mxu0  ;;  %268 = vst.msk [vmem:[%s503_s3 + $0x24] sm:$0xf] %vm258_vm4, %v315_v33  ;;  %v179_v38 = vadd.f32 %v434_v13, %v178_v35  ;;  %v351_v39 = vpop.f32.mrb[5].mxu1 }
  0xe5   :  { %v149_v40 = vpop.f32.mrb[6].mxu0  ;;  %v181_v41 = vpop.f32.mrb[6].mxu1 }
  0xe6   :  { %v194_v42 = vmax.f32 %v147_v36, 0.0  ;;  %v150_v43 = vadd.f32 %v434_v13, %v149_v40  ;;  %v336_v44 = vpop.f32.mrb[7].mxu0  ;;  %v202_v45 = vmax.f32 %v179_v38, 0.0  ;;  %v182_v46 = vadd.f32 %v434_v13, %v181_v41  ;;  %v352_v47 = vpop.f32.mrb[7].mxu1 }
  0xe8   :  { %v308_v48 = vpack.c.bf16 %v194_v42, %v194_v42  ;;  %v195_v49 = vmax.f32 %v150_v43, 0.0  ;;  %v316_v50 = vpack.c.bf16 %v202_v45, %v202_v45  ;;  %v203_v51 = vmax.f32 %v182_v46, 0.0 }
  0xea   :  { %261 = vst.msk [vmem:[%s503_s3 + $0x8] sm:$0xf] %vm258_vm4, %v308_v48  ;;  %v309_v52 = vpack.c.bf16 %v195_v49, %v195_v49  ;;  %269 = vst.msk [vmem:[%s503_s3 + $0x28] sm:$0xf] %vm258_vm4, %v316_v50  ;;  %v317_v53 = vpack.c.bf16 %v203_v51, %v203_v51 }
  0xeb   :  { %v154_v54 = vpop.f32.mrb[8].mxu0  ;;  %v186_v55 = vpop.f32.mrb[8].mxu1 }
  0xec   :  { %262 = vst.msk [vmem:[%s503_s3 + $0xc] sm:$0xf] %vm258_vm4, %v309_v52  ;;  %v155_v56 = vadd.f32 %v434_v13, %v154_v54  ;;  %v339_v57 = vpop.f32.mrb[9].mxu0  ;;  %270 = vst.msk [vmem:[%s503_s3 + $0x2c] sm:$0xf] %vm258_vm4, %v317_v53  ;;  %v187_v58 = vadd.f32 %v434_v13, %v186_v55  ;;  %v355_v59 = vpop.f32.mrb[9].mxu1 }
  0xed   :  { %v157_v60 = vpop.f32.mrb[10].mxu0  ;;  %v189_v61 = vpop.f32.mrb[10].mxu1 }
  0xee   :  { %v196_v62 = vmax.f32 %v155_v56, 0.0  ;;  %v158_v63 = vadd.f32 %v434_v13, %v157_v60  ;;  %v340_v0 = vpop.f32.mrb[11].mxu0  ;;  %v204_v1 = vmax.f32 %v187_v58, 0.0  ;;  %v356_v2 = vpop.f32.mrb[11].mxu1 }
  0xf0   :  { %v310_v3 = vpack.c.bf16 %v196_v62, %v196_v62  ;;  %v197_v4 = vmax.f32 %v158_v63, 0.0  ;;  %v318_v5 = vpack.c.bf16 %v204_v1, %v204_v1 }
  0xf2   :  { %263 = vst.msk [vmem:[%s503_s3 + $0x10] sm:$0xf] %vm258_vm4, %v310_v3  ;;  %v311_v6 = vpack.c.bf16 %v197_v4, %v197_v4 }
  0xf3   :  { %272 = vst.msk [vmem:[%s503_s3 + $0x30] sm:$0x1] %vm271_vm5, %v318_v5  ;;  %v162_v7 = vpop.f32.mrb[12].mxu0 }
  0xf4   :  { %264 = vst.msk [vmem:[%s503_s3 + $0x14] sm:$0xf] %vm258_vm4, %v311_v6  ;;  %v163_v8 = vadd.f32 %v434_v13, %v162_v7  ;;  %v343_v9 = vpop.f32.mrb[13].mxu0 }
  0xf5   :  { %v165_v10 = vpop.f32.mrb[14].mxu0 }
  0xf6   :  { %v198_v11 = vmax.f32 %v163_v8, 0.0  ;;  %v166_v12 = vadd.f32 %v434_v13, %v165_v10  ;;  %v344_v14 = vpop.f32.mrb[15].mxu0 }
  0xf8   :  { %v312_v15 = vpack.c.bf16 %v198_v11, %v198_v11  ;;  %v199_v16 = vmax.f32 %v166_v12, 0.0 }
  0xfa   :  { %265 = vst.msk [vmem:[%s503_s3 + $0x18] sm:$0xf] %vm258_vm4, %v312_v15  ;;  %v313_v17 = vpack.c.bf16 %v199_v16, %v199_v16 }
  0xfc   :  { %266 = vst.msk [vmem:[%s503_s3 + $0x1c] sm:$0xf] %vm258_vm4, %v313_v17 }

</bundles_post_ra>
